<compile_context>
chip_gen: v5e
topology: v5e:2x2
jax: 0.10.0
libtpu: 0.0.40
codegen_flags: <defaults>
</compile_context>

<pallas_src>
import jax
import jax.numpy as jnp
from jax.experimental import pallas as pl
from jax.experimental.pallas import tpu as pltpu

LANES = 128  # vreg lane width: every feature dim is zero-padded to this


def _round_up(x, m):
    return (x + m - 1) // m * m


def _pad2(a, rows, cols):
    return jnp.pad(a, ((0, rows - a.shape[0]), (0, cols - a.shape[1])))


def _choose_tiles(num_nodes):
    """Node padding + row/contraction tile sizes for the aggregation passes."""
    n_pad = _round_up(max(num_nodes, 512), 512)
    # Guarantee >= 2 row tiles so ("parallel", ...) actually splits across cores.
    row_tile = 256 if n_pad == 512 else 512
    k_tile = 512
    for cand in (2048, 1024):
        if n_pad % cand == 0:
            k_tile = cand
            break
    return n_pad, row_tile, k_tile


# --------------------------------------------------------------------------
# BlockSpec helpers
# --------------------------------------------------------------------------
def _invariant_spec(shape, index_map):
    """Grid-invariant input: single-buffer it when the installed Pallas supports it."""
    try:
        return pl.BlockSpec(shape, index_map, pipeline_mode=pl.Buffered(1))
    except TypeError:  # older BlockSpec without pipeline_mode
        return pl.BlockSpec(shape, index_map)


def _vmem_cap_bytes():
    try:
        cap = pltpu.get_tpu_info().vmem_capacity_bytes
    except Exception:  # pragma: no cover - conservative fallback
        cap = 64 * 1024 * 1024
    return cap * 3 // 4  # leave headroom for compiler-internal scratch / semaphores


def _compiler_params(dim_sem, vmem_estimate_bytes):
    vmem_limit = None
    if vmem_estimate_bytes > 12 * 1024 * 1024:
        vmem_limit = int(min(vmem_estimate_bytes * 5 // 4, _vmem_cap_bytes()))
    return pltpu.CompilerParams(
        dimension_semantics=dim_sem,
        vmem_limit_bytes=vmem_limit,
    )


def _transform_vmem_bytes(t1):
    return (2 * t1 * LANES * 2            # x tile (double-buffered, bf16)
            + 2 * LANES * LANES * 2       # W1 (count 2 buffers conservatively)
            + 2 * t1 * LANES * 2          # out tile (double-buffered, bf16)
            + (1 << 20))


def _aggregate_vmem_bytes(n_pad, row_tile, k_tile, out_itemsize):
    # Resident inputs counted at 2 buffers in case Buffered(1) is ignored.
    return (2 * row_tile * k_tile * 2        # A_hat tile (double-buffered, bf16)
            + 2 * n_pad * LANES * 2          # resident xw (bf16)
            + 2 * LANES * LANES * 2          # W2
            + 2 * 8 * LANES * 4              # bias (occupies a full 8-sublane tile)
            + 2 * row_tile * LANES * out_itemsize  # output tile (double-buffered)
            + row_tile * LANES * 4           # f32 accumulator scratch
            + (1 << 20))                     # margin


# --------------------------------------------------------------------------
# Kernels
# --------------------------------------------------------------------------
def _transform_kernel(x_ref, w_ref, o_ref):
    """o = x @ W1  (bf16 out for the downstream MXU passes)."""
    o_ref[...] = jnp.dot(
        x_ref[...], w_ref[...], preferred_element_type=jnp.float32
    ).astype(o_ref.dtype)


def _make_agg_relu_transform_kernel(k_tile):
    """acc += A_hat_tile @ xw1[k-slice]; at last k: o = relu(acc + b1) @ W2 (bf16)."""

    def kernel(a_ref, xw_ref, b_ref, w2_ref, o_ref, acc_ref):
        k = pl.program_id(1)

        @pl.when(k == 0)
        def _():
            acc_ref[...] = jnp.zeros_like(acc_ref)

        start = pl.multiple_of(k * k_tile, k_tile)
        acc_ref[...] += jnp.dot(
            a_ref[...], xw_ref[pl.ds(start, k_tile), :],
            preferred_element_type=jnp.float32,
        )

        @pl.when(k == pl.num_programs(1) - 1)
        def _():
            h = jnp.maximum(acc_ref[...] + b_ref[...], 0.0)
            o_ref[...] = jnp.dot(
                h.astype(w2_ref.dtype), w2_ref[...],
                preferred_element_type=jnp.float32,
            ).astype(o_ref.dtype)

    return kernel


def _make_agg_kernel(k_tile):
    """acc += A_hat_tile @ xw2[k-slice]; at last k: z = acc + b2 (f32)."""

    def kernel(a_ref, xw_ref, b_ref, o_ref, acc_ref):
        k = pl.program_id(1)

        @pl.when(k == 0)
        def _():
            acc_ref[...] = jnp.zeros_like(acc_ref)

        start = pl.multiple_of(k * k_tile, k_tile)
        acc_ref[...] += jnp.dot(
            a_ref[...], xw_ref[pl.ds(start, k_tile), :],
            preferred_element_type=jnp.float32,
        )

        @pl.when(k == pl.num_programs(1) - 1)
        def _():
            o_ref[...] = (acc_ref[...] + b_ref[...]).astype(o_ref.dtype)

    return kernel


# --------------------------------------------------------------------------
# Encoder: 3 pallas_calls on pre-padded inputs
# --------------------------------------------------------------------------
def gcn_encoder_pallas(x_pad, a_hat, w1, b1, w2, b2, row_tile, k_tile):
    """Two-layer GCN encoder.

      x_pad  (N_pad, 128)   bf16   zero-padded node features
      a_hat  (N_pad, N_pad) bf16   pre-normalized D^{-1/2}(A+I)D^{-1/2}
      w1, w2 (128, 128)     bf16   zero-padded weights
      b1, b2 (1, 128)       f32    zero-padded biases
    Returns (N_pad, 128) f32; caller slices the real rows / feature columns.
    """
    n_pad = x_pad.shape[0]

    # Pass 1: xw1 = X @ W1  (tiny O(N*128*128) pass — coarse row tile, one matmul).
    t1 = 1024 if n_pad % 1024 == 0 else 512
    xw1 = pl.pallas_call(
        _transform_kernel,
        out_shape=jax.ShapeDtypeStruct((n_pad, LANES), jnp.bfloat16),
        grid=(n_pad // t1,),
        in_specs=[pl.BlockSpec((t1, LANES), lambda i: (i, 0)),
                  _invariant_spec((LANES, LANES), lambda i: (0, 0))],
        out_specs=pl.BlockSpec((t1, LANES), lambda i: (i, 0)),
        compiler_params=_compiler_params(("parallel",), _transform_vmem_bytes(t1)),
    )(x_pad, w1)

    grid = (n_pad // row_tile, n_pad // k_tile)
    a_spec = pl.BlockSpec((row_tile, k_tile), lambda i, k: (i, k))
    xw_spec = _invariant_spec((n_pad, LANES), lambda i, k: (0, 0))
    b_spec = _invariant_spec((1, LANES), lambda i, k: (0, 0))
    w_spec = _invariant_spec((LANES, LANES), lambda i, k: (0, 0))
    out_spec = pl.BlockSpec((row_tile, LANES), lambda i, k: (i, 0))
    acc_scratch = pltpu.VMEM((row_tile, LANES), jnp.float32)
    dim_sem = ("parallel", "arbitrary")

    # Pass 2: xw2 = relu(A_hat @ xw1 + b1) @ W2   (fused; K-tiled contraction).
    xw2 = pl.pallas_call(
        _make_agg_relu_transform_kernel(k_tile),
        out_shape=jax.ShapeDtypeStruct((n_pad, LANES), jnp.bfloat16),
        grid=grid,
        in_specs=[a_spec, xw_spec, b_spec, w_spec],
        out_specs=out_spec,
        scratch_shapes=[acc_scratch],
        compiler_params=_compiler_params(
            dim_sem, _aggregate_vmem_bytes(n_pad, row_tile, k_tile, 2)),
    )(a_hat, xw1, b1, w2)

    # Pass 3: z = A_hat @ xw2 + b2.
    z = pl.pallas_call(
        _make_agg_kernel(k_tile),
        out_shape=jax.ShapeDtypeStruct((n_pad, LANES), jnp.float32),
        grid=grid,
        in_specs=[a_spec, xw_spec, b_spec],
        out_specs=out_spec,
        scratch_shapes=[acc_scratch],
        compiler_params=_compiler_params(
            dim_sem, _aggregate_vmem_bytes(n_pad, row_tile, k_tile, 4)),
    )(a_hat, xw2, b2)

    return z


# --------------------------------------------------------------------------
# Plain-JAX glue: params, embedding gather, normalized dense adjacency.
# --------------------------------------------------------------------------
def init_params(key, num_countries, num_sectors, embed_dim=16, hidden_dim=64):
    k1, k2, k3, k4 = jax.random.split(key, 4)
    return {
        # nn.Embedding default init: N(0, 1)
        "country_embed": jax.random.normal(k1, (num_countries, embed_dim), jnp.float32),
        "sector_embed": jax.random.normal(k2, (num_sectors, embed_dim), jnp.float32),
        # GCNConv weights (glorot-style scale), biases zero
        "w1": jax.random.normal(k3, (2 * embed_dim, hidden_dim), jnp.float32)
        * (2.0 / (2 * embed_dim + hidden_dim)) ** 0.5,
        "b1": jnp.zeros((1, hidden_dim), jnp.float32),
        "w2": jax.random.normal(k4, (hidden_dim, embed_dim), jnp.float32)
        * (2.0 / (hidden_dim + embed_dim)) ** 0.5,
        "b2": jnp.zeros((1, embed_dim), jnp.float32),
    }


def build_graph_tensors(edge_index, edge_attr, num_nodes, n_pad):
    """Dense A_hat = D^{-1/2}(A + I)D^{-1/2} in bf16 (norm folded in at build time)."""
    src = edge_index[0]
    dst = edge_index[1]
    w = edge_attr.astype(jnp.float32)
    # messages flow src -> dst, aggregated at dst: A[dst, src] += w
    a = jnp.zeros((n_pad, n_pad), jnp.float32).at[dst, src].add(w)
    node = jnp.arange(n_pad)
    self_w = (node < num_nodes).astype(jnp.float32)  # self-loops only for real nodes
    a = a.at[node, node].add(self_w)
    # weighted in-degree incl. self-loop, computed O(E)
    deg = jnp.zeros((n_pad,), jnp.float32).at[dst].add(w) + self_w
    d = jnp.where(deg > 0, jax.lax.rsqrt(deg), 0.0)
    a_hat = d[:, None] * a * d[None, :]
    return a_hat.astype(jnp.bfloat16)


def gnn_autoencoder_forward(params, node_x, edge_index, edge_attr):
    num_nodes = node_x.shape[0]
    embed_dim = params["country_embed"].shape[1]
    n_pad, row_tile, k_tile = _choose_tiles(num_nodes)

    # Embedding lookups + concat (glue, not the hot path).
    country_emb = jnp.take(params["country_embed"], node_x[:, 0], axis=0)
    sector_emb = jnp.take(params["sector_embed"], node_x[:, 1], axis=0)
    x = jnp.concatenate([country_emb, sector_emb], axis=1)  # (N, 2E)

    # Pad to lane-dense / MXU-aligned shapes; cast MXU operands to bf16.
    x_pad = _pad2(x, n_pad, LANES).astype(jnp.bfloat16)
    w1 = _pad2(params["w1"], LANES, LANES).astype(jnp.bfloat16)
    w2 = _pad2(params["w2"], LANES, LANES).astype(jnp.bfloat16)
    b1 = _pad2(params["b1"], 1, LANES)
    b2 = _pad2(params["b2"], 1, LANES)

    a_hat = build_graph_tensors(edge_index, edge_attr, num_nodes, n_pad)

    z_pad = gcn_encoder_pallas(x_pad, a_hat, w1, b1, w2, b2, row_tile, k_tile)
    return z_pad[:num_nodes, :embed_dim]


# --------------------------------------------------------------------------
# Pure-JAX f32 reference (loose bf16-tolerance sanity check)
# --------------------------------------------------------------------------
def _reference_forward(params, node_x, edge_index, edge_attr):
    n = node_x.shape[0]
    ce = jnp.take(params["country_embed"], node_x[:, 0], axis=0)
    se = jnp.take(params["sector_embed"], node_x[:, 1], axis=0)
    x = jnp.concatenate([ce, se], axis=1)
    src, dst = edge_index[0], edge_index[1]
    a = jnp.zeros((n, n), jnp.float32).at[dst, src].add(edge_attr.astype(jnp.float32))
    a = a + jnp.eye(n, dtype=jnp.float32)
    deg = jnp.sum(a, axis=1)
    dis = jnp.where(deg > 0, jax.lax.rsqrt(deg), 0.0)
    a_hat = dis[:, None] * a * dis[None, :]
    h = jnp.maximum(a_hat @ (x @ params["w1"]) + params["b1"], 0.0)
    return a_hat @ (h @ params["w2"]) + params["b2"]


if __name__ == "__main__":
    key = jax.random.PRNGKey(0)
    k_param, k_country, k_sector, k_src, k_dst, k_w = jax.random.split(key, 6)

    num_countries = 10
    num_sectors = 5
    embed_dim = 16
    hidden_dim = 64
    num_nodes = 32
    num_edges = 64

    params = init_params(k_param, num_countries, num_sectors, embed_dim, hidden_dim)

    # data.x: (N, 2) integer categorical features [country_id, sector_id]
    node_x = jnp.stack(
        [
            jax.random.randint(k_country, (num_nodes,), 0, num_countries),
            jax.random.randint(k_sector, (num_nodes,), 0, num_sectors),
        ],
        axis=1,
    ).astype(jnp.int32)

    # data.edge_index: (2, E) int, data.edge_attr: (E,) positive edge weights
    edge_index = jnp.stack(
        [
            jax.random.randint(k_src, (num_edges,), 0, num_nodes),
            jax.random.randint(k_dst, (num_edges,), 0, num_nodes),
        ],
        axis=0,
    ).astype(jnp.int32)
    edge_attr = jax.random.uniform(k_w, (num_edges,), jnp.float32, 0.1, 1.0)

    out = gnn_autoencoder_forward(params, node_x, edge_index, edge_attr)
    out = jax.block_until_ready(out)
    assert out.shape == (num_nodes, embed_dim)
    assert bool(jnp.all(jnp.isfinite(out)))

    # bf16-inputs / f32-accumulation vs full-f32 reference: loose tolerance check.
    ref = _reference_forward(params, node_x, edge_index, edge_attr)
    max_err = float(jnp.max(jnp.abs(out - ref)))
    assert max_err < 0.5, f"kernel deviates from f32 reference by {max_err}"

    print("KERNEL_OK")
</pallas_src>

<mosaic_0001>
module attributes {stable_mosaic.version = 11 : i64} {
  func.func @_transform_kernel(%arg0: i32, %arg1: memref<512x128xbf16, #tpu.memory_space<vmem>>, %arg2: memref<128x128xbf16, #tpu.memory_space<vmem>>, %arg3: memref<512x128xbf16, #tpu.memory_space<vmem>>) attributes {dimension_semantics = [#tpu.dimension_semantics<parallel>], iteration_bounds = array<i64: 1>, scalar_prefetch = 0 : i64, scratch_operands = 0 : i64, tpu.core_type = #tpu.core_type<tc>, window_params = [{transform_indices = @transform_0, window_bounds = array<i64: 512, 128>}, {pipeline_mode = #tpu.pipeline_mode<synchronous>, transform_indices = @transform_1, window_bounds = array<i64: 128, 128>}, {transform_indices = @transform_2, window_bounds = array<i64: 512, 128>}]} {
    %c0 = arith.constant 0 : index
    %c0_0 = arith.constant 0 : index
    %0 = vector.load %arg1[%c0, %c0_0] : memref<512x128xbf16, #tpu.memory_space<vmem>>, vector<512x128xbf16>
    %c0_1 = arith.constant 0 : index
    %c0_2 = arith.constant 0 : index
    %1 = vector.load %arg2[%c0_1, %c0_2] : memref<128x128xbf16, #tpu.memory_space<vmem>>, vector<128x128xbf16>
    %cst = arith.constant dense<0.000000e+00> : vector<512x128xf32>
    %2 = tpu.matmul %0, %1, %cst {dimension_numbers = #tpu.dot_dimension_numbers<[1], [0], [0], [1], [0, 0, 1, 1], [], []>} : vector<512x128xbf16>, vector<128x128xbf16>, vector<512x128xf32> -> vector<512x128xf32>
    %3 = arith.truncf %2 : vector<512x128xf32> to vector<512x128xbf16>
    %c0_3 = arith.constant 0 : index
    %c0_4 = arith.constant 0 : index
    %4 = vector.load %arg3[%c0_3, %c0_4] : memref<512x128xbf16, #tpu.memory_space<vmem>>, vector<512x128xbf16>
    tpu.vector_store %arg3[%c0_3, %c0_4], %3 {strides = array<i32>} : memref<512x128xbf16, #tpu.memory_space<vmem>>, vector<512x128xbf16>,
    return
  }
  func.func @transform_0(%arg0: i32) -> (i32, i32) {
    %c0_i32 = arith.constant 0 : i32
    %c0_i32_0 = arith.constant 0 : i32
    return %arg0, %c0_i32 : i32, i32
  }
  func.func @transform_1(%arg0: i32) -> (i32, i32) {
    %c0_i32 = arith.constant 0 : i32
    %c0_i32_0 = arith.constant 0 : i32
    %c0_i32_1 = arith.constant 0 : i32
    return %c0_i32, %c0_i32_0 : i32, i32
  }
  func.func @transform_2(%arg0: i32) -> (i32, i32) {
    %c0_i32 = arith.constant 0 : i32
    %c0_i32_0 = arith.constant 0 : i32
    return %arg0, %c0_i32 : i32, i32
  }
}

</mosaic_0001>

<bundles_post_ra>
// kernel: tpu_custom_call.1
= control target key start
LH: loop header
LB: loop body
LE: loop exit
PB: predicated region body
PF: predicated region fallthrough
CT: control target
= control target key end

     0   :  { %7 = vsyncpa [#allocation3], 0  ;;  %s1217_s0 = inlined_call_operand.hbm [shape: bf16[512,128], index: 0, kind: input, shape index: {}]   ;;  %s1218_s1 = inlined_call_operand.hbm [shape: bf16[128,128], index: 1, kind: input, shape index: {}]   ;;  %s1219_s2 = inlined_call_operand.hbm [shape: bf16[512,128], index: 2, kind: output, shape index: {}]  }
   0x1   :  { %8 = vsyncpa [#allocation6], 0 }
   0x2   :  { %9 = vsyncpa [#allocation4], 0  ;;  %s14_s11 = sshll.u32 %s1217_s0, 4  ;;  %s1179_s12 = smov [#allocation2]   ;;  %s15_s11 = int_to_ptr.hbm [resolvable:$true] %s14_s11 }
   0x3   :  { %s16_s13 = sshll.u32 %s1179_s12, 4  ;;  %s27_s16 = sshll.u32 %s1218_s1, 4  ;;  %s17_s13 = int_to_ptr.vmem [resolvable:$true] %s16_s13  ;;  %s28_s16 = int_to_ptr.hbm [resolvable:$true] %s27_s16 }
   0x4   :  { %s1180_s17 = smov 64   ;;  %s1181_s18 = smov 4  }
   0x5   :  { %22 = dma.hbm_to_vmem [thread:$0]  %s15_s11, 4096, %s17_s13, [#allocation3], %s1180_s17, %s1180_s17, %s1181_s18  }
   0x6   :  { %s1182_s19 = smov [#allocation5]  }
   0x7   :  { %s29_s20 = sshll.u32 %s1182_s19, 4  ;;  %s30_s20 = int_to_ptr.vmem [resolvable:$true] %s29_s20 }
   0x8   :  { %35 = dma.hbm_to_vmem [thread:$0]  %s28_s16, 1024, %s30_s20, [#allocation6], %s1180_s17, %s1180_s17, %s1181_s18  }
   0x9   :  { %1173 = dma.done.wait [#allocation3], 4096  }
   0xa   :  { %1174 = vsyncadd [#allocation3], 4294963200 }
   0xb   :  { %1175 = dma.done.wait [#allocation6], 1024  }
   0xc   :  { %1176 = vsyncadd [#allocation6], 4294966272  ;;  %v880_v0 = vld [vmem:[#allocation5 + $0x38] sm:$0xff]  ;;  %v879_v1 = vld [vmem:[#allocation5 + $0x30] sm:$0xff]  ;;  %s1183_s0 = smov [#allocation7]   ;;  %s667_s23 = sshll.u32 %s1219_s2, 4  ;;  %s668_s23 = int_to_ptr.hbm [resolvable:$true] %s667_s23 }
   0xd   :  { %364 = vmatpush.bf16.msra.mxu0 %v880_v0  ;;  %1072 = vmatpush.bf16.msra.mxu1 %v880_v0  ;;  %v878_v2 = vld [vmem:[#allocation5 + $0x28] sm:$0xff]  ;;  %v877_v3 = vld [vmem:[#allocation5 + $0x20] sm:$0xff]  ;;  %v876_v4 = vld [vmem:[#allocation5 + $0x18] sm:$0xff]  ;;  %s665_s1 = sshll.u32 %s1183_s0, 4  ;;  %s666_s1 = int_to_ptr.vmem [resolvable:$true] %s665_s1 }
   0xe   :  { %1073 = vmatpush.bf16.msra.mxu2 %v880_v0  ;;  %1074 = vmatpush.bf16.msra.mxu3 %v880_v0  ;;  %v875_v5 = vld [vmem:[#allocation5 + $0x10] sm:$0xff]  ;;  %v874_v6 = vld [vmem:[#allocation5 + $0x8] sm:$0xff]  ;;  %v873_v7 = vld [vmem:[#allocation5] sm:$0xff] }
   0xf   :  { %v841_v8 = vld [vmem:[#allocation2] sm:$0xff]  ;;  %v842_v12 = vld [vmem:[#allocation2 + $0x8] sm:$0xff]  ;;  %v843_v16 = vld [vmem:[#allocation2 + $0x10] sm:$0xff] }
  0x10   :  { %v849_v9 = vld [vmem:[#allocation2 + $0x40] sm:$0xff]  ;;  %v850_v13 = vld [vmem:[#allocation2 + $0x48] sm:$0xff]  ;;  %v851_v17 = vld [vmem:[#allocation2 + $0x50] sm:$0xff] }
  0x11   :  { %365 = vmatpush.bf16.msra.mxu0 %v879_v1  ;;  %1075 = vmatpush.bf16.msra.mxu1 %v879_v1  ;;  %v857_v10 = vld [vmem:[#allocation2 + $0x80] sm:$0xff]  ;;  %v858_v14 = vld [vmem:[#allocation2 + $0x88] sm:$0xff]  ;;  %v859_v18 = vld [vmem:[#allocation2 + $0x90] sm:$0xff] }
  0x12   :  { %1076 = vmatpush.bf16.msra.mxu2 %v879_v1  ;;  %1077 = vmatpush.bf16.msra.mxu3 %v879_v1  ;;  %v865_v11 = vld [vmem:[#allocation2 + $0xc0] sm:$0xff]  ;;  %v866_v15 = vld [vmem:[#allocation2 + $0xc8] sm:$0xff]  ;;  %v867_v19 = vld [vmem:[#allocation2 + $0xd0] sm:$0xff] }
  0x13   :  { %v844_v20 = vld [vmem:[#allocation2 + $0x18] sm:$0xff]  ;;  %v845_v24 = vld [vmem:[#allocation2 + $0x20] sm:$0xff]  ;;  %v846_v28 = vld [vmem:[#allocation2 + $0x28] sm:$0xff] }
  0x14   :  { %v852_v21 = vld [vmem:[#allocation2 + $0x58] sm:$0xff]  ;;  %v853_v25 = vld [vmem:[#allocation2 + $0x60] sm:$0xff]  ;;  %v854_v29 = vld [vmem:[#allocation2 + $0x68] sm:$0xff] }
  0x15   :  { %366 = vmatpush.bf16.msra.mxu0 %v878_v2  ;;  %1078 = vmatpush.bf16.msra.mxu1 %v878_v2  ;;  %v860_v22 = vld [vmem:[#allocation2 + $0x98] sm:$0xff]  ;;  %v861_v26 = vld [vmem:[#allocation2 + $0xa0] sm:$0xff]  ;;  %v862_v30 = vld [vmem:[#allocation2 + $0xa8] sm:$0xff] }
  0x16   :  { %1079 = vmatpush.bf16.msra.mxu2 %v878_v2  ;;  %1080 = vmatpush.bf16.msra.mxu3 %v878_v2  ;;  %v868_v23 = vld [vmem:[#allocation2 + $0xd8] sm:$0xff]  ;;  %v869_v27 = vld [vmem:[#allocation2 + $0xe0] sm:$0xff]  ;;  %v870_v31 = vld [vmem:[#allocation2 + $0xe8] sm:$0xff] }
  0x17   :  { %v847_v32 = vld [vmem:[#allocation2 + $0x30] sm:$0xff]  ;;  %v848_v36 = vld [vmem:[#allocation2 + $0x38] sm:$0xff] }
  0x18   :  { %v855_v33 = vld [vmem:[#allocation2 + $0x70] sm:$0xff]  ;;  %v856_v37 = vld [vmem:[#allocation2 + $0x78] sm:$0xff] }
  0x19   :  { %367 = vmatpush.bf16.msra.mxu0 %v877_v3  ;;  %1081 = vmatpush.bf16.msra.mxu1 %v877_v3  ;;  %v863_v34 = vld [vmem:[#allocation2 + $0xb0] sm:$0xff]  ;;  %v864_v38 = vld [vmem:[#allocation2 + $0xb8] sm:$0xff] }
  0x1a   :  { %1082 = vmatpush.bf16.msra.mxu2 %v877_v3  ;;  %1083 = vmatpush.bf16.msra.mxu3 %v877_v3  ;;  %v871_v35 = vld [vmem:[#allocation2 + $0xf0] sm:$0xff]  ;;  %v872_v39 = vld [vmem:[#allocation2 + $0xf8] sm:$0xff] }
  0x1d   :  { %368 = vmatpush.bf16.msra.mxu0 %v876_v4  ;;  %1084 = vmatpush.bf16.msra.mxu1 %v876_v4 }
  0x1e   :  { %1085 = vmatpush.bf16.msra.mxu2 %v876_v4  ;;  %1086 = vmatpush.bf16.msra.mxu3 %v876_v4 }
  0x21   :  { %369 = vmatpush.bf16.msra.mxu0 %v875_v5  ;;  %1087 = vmatpush.bf16.msra.mxu1 %v875_v5 }
  0x22   :  { %1088 = vmatpush.bf16.msra.mxu2 %v875_v5  ;;  %1089 = vmatpush.bf16.msra.mxu3 %v875_v5 }
  0x25   :  { %370 = vmatpush.bf16.msra.mxu0 %v874_v6  ;;  %1090 = vmatpush.bf16.msra.mxu1 %v874_v6 }
  0x26   :  { %1091 = vmatpush.bf16.msra.mxu2 %v874_v6  ;;  %1092 = vmatpush.bf16.msra.mxu3 %v874_v6 }
  0x29   :  { %371 = vmatpush.bf16.msra.mxu0 %v873_v7  ;;  %1093 = vmatpush.bf16.msra.mxu1 %v873_v7 }
  0x2a   :  { %1094 = vmatpush.bf16.msra.mxu2 %v873_v7  ;;  %1095 = vmatpush.bf16.msra.mxu3 %v873_v7 }
  0x2c   :  { %372 = vmatmul.bf16.vlgmr.msra.gmra.mxu0 %v841_v8  ;;  %412 = vmatmul.bf16.vlgmr.msra.gmra.mxu1 %v849_v9 }
  0x2d   :  { %452 = vmatmul.bf16.vlgmr.msra.gmra.mxu2 %v857_v10  ;;  %492 = vmatmul.bf16.vlgmr.msra.gmra.mxu3 %v865_v11 }
  0x3c   :  { %377 = vmatmul.bf16.gmra.mxu0 %v842_v12  ;;  %417 = vmatmul.bf16.gmra.mxu1 %v850_v13 }
  0x3d   :  { %457 = vmatmul.bf16.gmra.mxu2 %v858_v14  ;;  %497 = vmatmul.bf16.gmra.mxu3 %v866_v15 }
  0x4c   :  { %382 = vmatmul.bf16.gmra.mxu0 %v843_v16  ;;  %422 = vmatmul.bf16.gmra.mxu1 %v851_v17 }
  0x4d   :  { %462 = vmatmul.bf16.gmra.mxu2 %v859_v18  ;;  %502 = vmatmul.bf16.gmra.mxu3 %v867_v19 }
  0x5c   :  { %387 = vmatmul.bf16.gmra.mxu0 %v844_v20  ;;  %427 = vmatmul.bf16.gmra.mxu1 %v852_v21 }
  0x5d   :  { %467 = vmatmul.bf16.gmra.mxu2 %v860_v22  ;;  %507 = vmatmul.bf16.gmra.mxu3 %v868_v23 }
  0x6c   :  { %392 = vmatmul.bf16.gmra.mxu0 %v845_v24  ;;  %432 = vmatmul.bf16.gmra.mxu1 %v853_v25 }
  0x6d   :  { %472 = vmatmul.bf16.gmra.mxu2 %v861_v26  ;;  %512 = vmatmul.bf16.gmra.mxu3 %v869_v27 }
  0x7c   :  { %397 = vmatmul.bf16.gmra.mxu0 %v846_v28  ;;  %437 = vmatmul.bf16.gmra.mxu1 %v854_v29 }
  0x7d   :  { %477 = vmatmul.bf16.gmra.mxu2 %v862_v30  ;;  %517 = vmatmul.bf16.gmra.mxu3 %v870_v31 }
  0x8c   :  { %402 = vmatmul.bf16.gmra.mxu0 %v847_v32  ;;  %442 = vmatmul.bf16.gmra.mxu1 %v855_v33 }
  0x8d   :  { %482 = vmatmul.bf16.gmra.mxu2 %v863_v34  ;;  %522 = vmatmul.bf16.gmra.mxu3 %v871_v35 }
  0x9c   :  { %407 = vmatmul.bf16.gmra.mxu0 %v848_v36  ;;  %447 = vmatmul.bf16.gmra.mxu1 %v856_v37 }
  0x9d   :  { %487 = vmatmul.bf16.gmra.mxu2 %v864_v38  ;;  %527 = vmatmul.bf16.gmra.mxu3 %v872_v39 }
  0xa9   :  { %v373_v40 = vpop.f32.mrf.mxu0  ;;  %v413_v41 = vpop.f32.mrf.mxu1 }
  0xb0   :  { %v453_v42 = vpop.f32.mrf.mxu2  ;;  %v493_v43 = vpop.f32.mrf.mxu3 }
  0xb1   :  { %v375_v44 = vpop.f32.mrf.mxu0  ;;  %v415_v45 = vpop.f32.mrf.mxu1 }
  0xb2   :  { %v884_v46 = vpack.c.bf16 %v375_v44, %v373_v40  ;;  %v924_v47 = vpack.c.bf16 %v415_v45, %v413_v41 }
  0xb4   :  { %885 = vst [vmem:[#allocation7] sm:$0xff] %v884_v46  }
  0xb5   :  { %1048 = vst [vmem:[#allocation7 + $0x40] sm:$0xff] %v924_v47  }
  0xb8   :  { %v455_v48 = vpop.f32.mrf.mxu2  ;;  %v495_v49 = vpop.f32.mrf.mxu3 }
  0xb9   :  { %v964_v50 = vpack.c.bf16 %v455_v48, %v453_v42  ;;  %v1004_v51 = vpack.c.bf16 %v495_v49, %v493_v43  ;;  %v378_v52 = vpop.f32.mrf.mxu0  ;;  %v418_v53 = vpop.f32.mrf.mxu1 }
  0xbb   :  { %1056 = vst [vmem:[#allocation7 + $0x80] sm:$0xff] %v964_v50  }
  0xbc   :  { %1064 = vst [vmem:[#allocation7 + $0xc0] sm:$0xff] %v1004_v51  }
  0xc0   :  { %v458_v54 = vpop.f32.mrf.mxu2  ;;  %v498_v55 = vpop.f32.mrf.mxu3 }
  0xc1   :  { %v380_v56 = vpop.f32.mrf.mxu0  ;;  %v420_v57 = vpop.f32.mrf.mxu1 }
  0xc2   :  { %v889_v58 = vpack.c.bf16 %v380_v56, %v378_v52  ;;  %v929_v59 = vpack.c.bf16 %v420_v57, %v418_v53 }
  0xc4   :  { %1041 = vst [vmem:[#allocation7 + $0x8] sm:$0xff] %v889_v58  }
  0xc5   :  { %1049 = vst [vmem:[#allocation7 + $0x48] sm:$0xff] %v929_v59  }
  0xc8   :  { %v460_v60 = vpop.f32.mrf.mxu2  ;;  %v500_v61 = vpop.f32.mrf.mxu3 }
  0xc9   :  { %v969_v62 = vpack.c.bf16 %v460_v60, %v458_v54  ;;  %v1009_v63 = vpack.c.bf16 %v500_v61, %v498_v55  ;;  %v383_v0 = vpop.f32.mrf.mxu0  ;;  %v423_v1 = vpop.f32.mrf.mxu1 }
  0xcb   :  { %1057 = vst [vmem:[#allocation7 + $0x88] sm:$0xff] %v969_v62  }
  0xcc   :  { %1065 = vst [vmem:[#allocation7 + $0xc8] sm:$0xff] %v1009_v63  }
  0xd0   :  { %v463_v2 = vpop.f32.mrf.mxu2  ;;  %v503_v3 = vpop.f32.mrf.mxu3 }
  0xd1   :  { %v385_v4 = vpop.f32.mrf.mxu0  ;;  %v425_v5 = vpop.f32.mrf.mxu1 }
  0xd2   :  { %v894_v6 = vpack.c.bf16 %v385_v4, %v383_v0  ;;  %v934_v7 = vpack.c.bf16 %v425_v5, %v423_v1 }
  0xd4   :  { %1042 = vst [vmem:[#allocation7 + $0x10] sm:$0xff] %v894_v6  }
  0xd5   :  { %1050 = vst [vmem:[#allocation7 + $0x50] sm:$0xff] %v934_v7  }
  0xd8   :  { %v465_v8 = vpop.f32.mrf.mxu2  ;;  %v505_v9 = vpop.f32.mrf.mxu3 }
  0xd9   :  { %v974_v10 = vpack.c.bf16 %v465_v8, %v463_v2  ;;  %v1014_v11 = vpack.c.bf16 %v505_v9, %v503_v3  ;;  %v388_v12 = vpop.f32.mrf.mxu0  ;;  %v428_v13 = vpop.f32.mrf.mxu1 }
  0xdb   :  { %1058 = vst [vmem:[#allocation7 + $0x90] sm:$0xff] %v974_v10  }
  0xdc   :  { %1066 = vst [vmem:[#allocation7 + $0xd0] sm:$0xff] %v1014_v11  }
  0xe0   :  { %v468_v14 = vpop.f32.mrf.mxu2  ;;  %v508_v15 = vpop.f32.mrf.mxu3 }
  0xe1   :  { %v390_v16 = vpop.f32.mrf.mxu0  ;;  %v430_v17 = vpop.f32.mrf.mxu1 }
  0xe2   :  { %v899_v18 = vpack.c.bf16 %v390_v16, %v388_v12  ;;  %v939_v19 = vpack.c.bf16 %v430_v17, %v428_v13 }
  0xe4   :  { %1043 = vst [vmem:[#allocation7 + $0x18] sm:$0xff] %v899_v18  }
  0xe5   :  { %1051 = vst [vmem:[#allocation7 + $0x58] sm:$0xff] %v939_v19  }
  0xe8   :  { %v470_v20 = vpop.f32.mrf.mxu2  ;;  %v510_v21 = vpop.f32.mrf.mxu3 }
  0xe9   :  { %v979_v22 = vpack.c.bf16 %v470_v20, %v468_v14  ;;  %v1019_v23 = vpack.c.bf16 %v510_v21, %v508_v15  ;;  %v393_v24 = vpop.f32.mrf.mxu0  ;;  %v433_v25 = vpop.f32.mrf.mxu1 }
  0xeb   :  { %1059 = vst [vmem:[#allocation7 + $0x98] sm:$0xff] %v979_v22  }
  0xec   :  { %1067 = vst [vmem:[#allocation7 + $0xd8] sm:$0xff] %v1019_v23  }
  0xf0   :  { %v473_v26 = vpop.f32.mrf.mxu2  ;;  %v513_v27 = vpop.f32.mrf.mxu3 }
  0xf1   :  { %v395_v28 = vpop.f32.mrf.mxu0  ;;  %v435_v29 = vpop.f32.mrf.mxu1 }
  0xf2   :  { %v904_v30 = vpack.c.bf16 %v395_v28, %v393_v24  ;;  %v944_v31 = vpack.c.bf16 %v435_v29, %v433_v25 }
  0xf4   :  { %1044 = vst [vmem:[#allocation7 + $0x20] sm:$0xff] %v904_v30  }
  0xf5   :  { %1052 = vst [vmem:[#allocation7 + $0x60] sm:$0xff] %v944_v31  }
  0xf8   :  { %v475_v32 = vpop.f32.mrf.mxu2  ;;  %v515_v33 = vpop.f32.mrf.mxu3 }
  0xf9   :  { %v984_v34 = vpack.c.bf16 %v475_v32, %v473_v26  ;;  %v1024_v35 = vpack.c.bf16 %v515_v33, %v513_v27  ;;  %v398_v36 = vpop.f32.mrf.mxu0  ;;  %v438_v37 = vpop.f32.mrf.mxu1 }
  0xfb   :  { %1060 = vst [vmem:[#allocation7 + $0xa0] sm:$0xff] %v984_v34  }
  0xfc   :  { %1068 = vst [vmem:[#allocation7 + $0xe0] sm:$0xff] %v1024_v35  }
 0x100   :  { %v478_v38 = vpop.f32.mrf.mxu2  ;;  %v518_v39 = vpop.f32.mrf.mxu3 }
 0x101   :  { %v400_v40 = vpop.f32.mrf.mxu0  ;;  %v440_v41 = vpop.f32.mrf.mxu1 }
 0x102   :  { %v909_v42 = vpack.c.bf16 %v400_v40, %v398_v36  ;;  %v949_v43 = vpack.c.bf16 %v440_v41, %v438_v37 }
 0x104   :  { %1045 = vst [vmem:[#allocation7 + $0x28] sm:$0xff] %v909_v42  }
 0x105   :  { %1053 = vst [vmem:[#allocation7 + $0x68] sm:$0xff] %v949_v43  }
 0x108   :  { %v480_v44 = vpop.f32.mrf.mxu2  ;;  %v520_v45 = vpop.f32.mrf.mxu3 }
 0x109   :  { %v989_v46 = vpack.c.bf16 %v480_v44, %v478_v38  ;;  %v1029_v47 = vpack.c.bf16 %v520_v45, %v518_v39  ;;  %v403_v48 = vpop.f32.mrf.mxu0  ;;  %v443_v49 = vpop.f32.mrf.mxu1 }
 0x10b   :  { %1061 = vst [vmem:[#allocation7 + $0xa8] sm:$0xff] %v989_v46  }
 0x10c   :  { %1069 = vst [vmem:[#allocation7 + $0xe8] sm:$0xff] %v1029_v47  }
 0x110   :  { %v483_v50 = vpop.f32.mrf.mxu2  ;;  %v523_v51 = vpop.f32.mrf.mxu3 }
 0x111   :  { %v405_v52 = vpop.f32.mrf.mxu0  ;;  %v445_v53 = vpop.f32.mrf.mxu1 }
 0x112   :  { %v914_v54 = vpack.c.bf16 %v405_v52, %v403_v48  ;;  %v954_v55 = vpack.c.bf16 %v445_v53, %v443_v49 }
 0x114   :  { %1046 = vst [vmem:[#allocation7 + $0x30] sm:$0xff] %v914_v54  }
 0x115   :  { %1054 = vst [vmem:[#allocation7 + $0x70] sm:$0xff] %v954_v55  }
 0x118   :  { %v485_v56 = vpop.f32.mrf.mxu2  ;;  %v525_v57 = vpop.f32.mrf.mxu3 }
 0x119   :  { %v994_v58 = vpack.c.bf16 %v485_v56, %v483_v50  ;;  %v1034_v59 = vpack.c.bf16 %v525_v57, %v523_v51  ;;  %v408_v60 = vpop.f32.mrf.mxu0  ;;  %v448_v61 = vpop.f32.mrf.mxu1 }
 0x11b   :  { %1062 = vst [vmem:[#allocation7 + $0xb0] sm:$0xff] %v994_v58  }
 0x11c   :  { %1070 = vst [vmem:[#allocation7 + $0xf0] sm:$0xff] %v1034_v59  }
 0x120   :  { %v488_v62 = vpop.f32.mrf.mxu2  ;;  %v528_v63 = vpop.f32.mrf.mxu3 }
 0x121   :  { %v410_v0 = vpop.f32.mrf.mxu0  ;;  %v450_v1 = vpop.f32.mrf.mxu1 }
 0x122   :  { %v919_v2 = vpack.c.bf16 %v410_v0, %v408_v60  ;;  %v959_v3 = vpack.c.bf16 %v450_v1, %v448_v61 }
 0x124   :  { %1047 = vst [vmem:[#allocation7 + $0x38] sm:$0xff] %v919_v2  }
 0x125   :  { %1055 = vst [vmem:[#allocation7 + $0x78] sm:$0xff] %v959_v3  }
 0x128   :  { %v490_v4 = vpop.f32.mrf.mxu2  ;;  %v530_v5 = vpop.f32.mrf.mxu3 }
 0x129   :  { %v999_v6 = vpack.c.bf16 %v490_v4, %v488_v62  ;;  %v1039_v7 = vpack.c.bf16 %v530_v5, %v528_v63 }
 0x12b   :  { %1063 = vst [vmem:[#allocation7 + $0xb8] sm:$0xff] %v999_v6  }
 0x12c   :  { %1071 = vst [vmem:[#allocation7 + $0xf8] sm:$0xff] %v1039_v7  }
 0x12d   :  { %673 = dma.vmem_to_hbm [thread:$0]  %s666_s1, 4096, %s668_s23, [#allocation4], %s1180_s17, %s1180_s17, %s1181_s18  }
 0x12e   :  { %1177 = dma.done.wait [#allocation4], 4096  }
 0x12f   :  { %1178 = vsyncadd [#allocation4], 4294963200 }
 0x130   :  { %678 = vsyncpa [#allocation3], 1 }
 0x131   :  { %679 = vsyncpa [#allocation6], 1 }
 0x132   :  { %680 = vsyncpa [#allocation4], 1 }

</bundles_post_ra>
